<compile_context>
chip_gen: v5e
topology: v5e:2x2
jax: 0.10.0
libtpu: 0.0.40
codegen_flags: <defaults>
</compile_context>

<pallas_src>
import functools

import jax
import jax.numpy as jnp
from jax.experimental import pallas as pl
from jax.experimental.pallas import tpu as pltpu

# Below this many bytes a single DMA descriptor is optimal; extra descriptors
# are pure issue overhead.  Above it, concurrent chunked DMAs help saturate HBM.
_CHUNK_THRESHOLD_BYTES = 4 * 1024 * 1024  # 4 MiB
_MAX_CHUNKS = 8


def _chunk_plan(sl: int, row_bytes: int):
    """Static tuple of (row_start, row_count) chunks covering [0, sl)."""
    total = sl * row_bytes
    if sl <= 1 or total <= _CHUNK_THRESHOLD_BYTES:
        return ((0, sl),)
    k = min(_MAX_CHUNKS, sl, max(2, total // _CHUNK_THRESHOLD_BYTES))
    base, rem = divmod(sl, k)
    chunks, start = [], 0
    for i in range(k):
        rows = base + (1 if i < rem else 0)
        if rows > 0:
            chunks.append((start, rows))
            start += rows
    return tuple(chunks)


def _pos_emb_copy_kernel(emb_hbm, out_hbm, copy_sem, *, chunks):
    # Start every HBM->HBM DMA first (concurrent in-flight copies), then wait.
    # `chunks` is a static Python tuple baked in via functools.partial.
    copies = []
    for i, (start, rows) in enumerate(chunks):
        cp = pltpu.make_async_copy(
            emb_hbm.at[pl.ds(start, rows), :],
            out_hbm.at[pl.ds(start, rows), :],
            copy_sem.at[i],
        )
        cp.start()
        copies.append(cp)
    for cp in copies:
        cp.wait()


def _pallas_copy(emb_weight: jax.Array, sl: int, chunks) -> jax.Array:
    seq_len, model_dim = emb_weight.shape
    nbytes = sl * model_dim * jnp.dtype(emb_weight.dtype).itemsize
    kernel = functools.partial(_pos_emb_copy_kernel, chunks=chunks)
    return pl.pallas_call(
        kernel,
        out_shape=jax.ShapeDtypeStruct((sl, model_dim), emb_weight.dtype),
        # Both operands stay in HBM; the kernel body issues the DMAs itself.
        in_specs=[pl.BlockSpec(memory_space=pl.ANY)],
        out_specs=pl.BlockSpec(memory_space=pl.ANY),
        scratch_shapes=[pltpu.SemaphoreType.DMA((len(chunks),))],
        cost_estimate=pl.CostEstimate(
            flops=0, transcendentals=0, bytes_accessed=2 * nbytes),
    )(emb_weight)


def learned_position_embeddings_fwd(emb_weight: jax.Array,
                                    x: jax.Array,
                                    *,
                                    use_pallas: bool = True) -> jax.Array:
    """Pallas equivalent of LearnedPositionEmbeddings.forward(x).

    Returns emb_weight[:x.shape[1], :].  With use_pallas=False, returns a plain
    static slice so XLA can fuse it into the consumer (preferred when the
    result is immediately consumed, e.g. tok_emb + pos_emb).
    """
    sl = x.shape[1]
    seq_len, model_dim = emb_weight.shape
    assert sl <= seq_len, "requested positions exceed table size"

    if sl == 0:
        return jnp.zeros((0, model_dim), emb_weight.dtype)

    if not use_pallas:
        return jax.lax.slice(emb_weight, (0, 0), (sl, model_dim))

    row_bytes = model_dim * jnp.dtype(emb_weight.dtype).itemsize
    chunks = _chunk_plan(sl, row_bytes)
    return _pallas_copy(emb_weight, sl, chunks)


def get_fixed_embedding(emb_weight: jax.Array, ind: int) -> jax.Array:
    # PyTorch: self.emb(torch.tensor([ind])).unsqueeze(0) -> (1, 1, model_dim)
    # Single-row lookup; pure-JAX glue (no hot loop worth a kernel).
    return emb_weight[ind][None, None, :]


if __name__ == "__main__":
    # Small shapes consistent with the module's forward (only x.shape[1] used).
    seq_len, model_dim = 64, 32          # nn.Embedding(seq_len, model_dim)
    batch, sl = 2, 8                     # x: (B, S, D); forward uses S only

    key = jax.random.PRNGKey(0)
    k_emb, k_x = jax.random.split(key)

    # Deterministic init mirroring emb.weight.data.normal_(0.0, 0.02)
    emb_weight = (0.02 * jax.random.normal(k_emb, (seq_len, model_dim))
                  ).astype(jnp.float32)
    x = jax.random.normal(k_x, (batch, sl, model_dim), dtype=jnp.float32)

    ref = emb_weight[:sl, :]

    # 1) Default (single-DMA) Pallas path.
    out = jax.block_until_ready(learned_position_embeddings_fwd(emb_weight, x))
    assert out.shape == (sl, model_dim)
    assert jnp.allclose(out, ref), "mismatch vs reference slice (single DMA)"

    # 2) Exercise the multi-chunk concurrent-DMA path at small size by forcing
    #    a 3-way chunk plan (same code path large tables take automatically).
    forced_chunks = ((0, 3), (3, 3), (6, 2))
    out_chunked = jax.block_until_ready(_pallas_copy(emb_weight, sl, forced_chunks))
    assert jnp.allclose(out_chunked, ref), "mismatch vs reference (chunked DMAs)"

    # 3) Fused/slice path (preferred when a consumer can absorb the slice).
    out_slice = jax.block_until_ready(
        learned_position_embeddings_fwd(emb_weight, x, use_pallas=False))
    assert jnp.allclose(out_slice, ref), "mismatch vs reference (lax.slice)"

    # 4) get_fixed_embedding sanity check (pure JAX path).
    fixed = jax.block_until_ready(get_fixed_embedding(emb_weight, 3))
    assert fixed.shape == (1, 1, model_dim)
    assert jnp.allclose(fixed[0, 0], emb_weight[3])

    print("KERNEL_OK")
</pallas_src>

<mosaic_0001>
module attributes {stable_mosaic.version = 11 : i64} {
  func.func @_pos_emb_copy_kernel(%arg0: memref<64x32xf32, #tpu.memory_space<any>>, %arg1: memref<8x32xf32, #tpu.memory_space<any>>, %arg2: memref<1x!tpu.dma_semaphore, #tpu.memory_space<semaphore_mem>>) attributes {dimension_semantics = [], scalar_prefetch = 0 : i64, scratch_operands = 1 : i64, tpu.core_type = #tpu.core_type<tc>} {
    %c0_i32 = arith.constant 0 : i32
    %c0_i32_0 = arith.constant 0 : i32
    %c0_i32_1 = arith.constant 0 : i32
    %0 = tpu.memref_slice %arg0[%c0_i32_0, %c0_i32_1] : memref<64x32xf32, #tpu.memory_space<any>> -> memref<8x32xf32, #tpu.memory_space<any>>
    %c0_i32_2 = arith.constant 0 : i32
    %c0_i32_3 = arith.constant 0 : i32
    %1 = tpu.memref_slice %arg1[%c0_i32_2, %c0_i32_3] : memref<8x32xf32, #tpu.memory_space<any>> -> memref<8x32xf32, #tpu.memory_space<any>>
    %2 = tpu.memref_slice %arg2[%c0_i32] : memref<1x!tpu.dma_semaphore, #tpu.memory_space<semaphore_mem>> -> memref<1x!tpu.dma_semaphore, #tpu.memory_space<semaphore_mem>>
    %3 = tpu.memref_squeeze %2 : memref<1x!tpu.dma_semaphore, #tpu.memory_space<semaphore_mem>> -> memref<!tpu.dma_semaphore, #tpu.memory_space<semaphore_mem>>
    tpu.enqueue_dma source(%0 : memref<8x32xf32, #tpu.memory_space<any>>) target(%1 : memref<8x32xf32, #tpu.memory_space<any>>) target_semaphore(%3 : memref<!tpu.dma_semaphore, #tpu.memory_space<semaphore_mem>>)
    %c0_i32_4 = arith.constant 0 : i32
    %c0_i32_5 = arith.constant 0 : i32
    %c0_i32_6 = arith.constant 0 : i32
    %4 = tpu.memref_slice %arg0[%c0_i32_5, %c0_i32_6] : memref<64x32xf32, #tpu.memory_space<any>> -> memref<8x32xf32, #tpu.memory_space<any>>
    %c0_i32_7 = arith.constant 0 : i32
    %c0_i32_8 = arith.constant 0 : i32
    %5 = tpu.memref_slice %arg1[%c0_i32_7, %c0_i32_8] : memref<8x32xf32, #tpu.memory_space<any>> -> memref<8x32xf32, #tpu.memory_space<any>>
    %6 = tpu.memref_slice %arg2[%c0_i32_4] : memref<1x!tpu.dma_semaphore, #tpu.memory_space<semaphore_mem>> -> memref<1x!tpu.dma_semaphore, #tpu.memory_space<semaphore_mem>>
    %7 = tpu.memref_squeeze %6 : memref<1x!tpu.dma_semaphore, #tpu.memory_space<semaphore_mem>> -> memref<!tpu.dma_semaphore, #tpu.memory_space<semaphore_mem>>
    tpu.wait_dma2 semaphore(%7 : memref<!tpu.dma_semaphore, #tpu.memory_space<semaphore_mem>>) src(%4 : memref<8x32xf32, #tpu.memory_space<any>>) dst(%5 : memref<8x32xf32, #tpu.memory_space<any>>)
    return
  }
}

</mosaic_0001>

<bundles_post_ra>
// kernel: tpu_custom_call.1
= control target key start
LH: loop header
LB: loop body
LE: loop exit
PB: predicated region body
PF: predicated region fallthrough
CT: control target
= control target key end

     0   :  { %s71_s0 = inlined_call_operand.vmem [shape: f32[64,32], index: 0, kind: input, shape index: {}]   ;;  %s72_s1 = inlined_call_operand.hbm [shape: f32[8,32], index: 1, kind: output, shape index: {}]  }
   0x1   :  { %s13_s8 = sshll.u32 %s71_s0, 4  ;;  %s15_s11 = sshll.u32 %s72_s1, 4  ;;  %s14_s8 = int_to_ptr.vmem [resolvable:$true] %s13_s8  ;;  %s16_s11 = int_to_ptr.hbm [resolvable:$true] %s15_s11 }
   0x2   :  { %18 = dma.vmem_to_hbm [thread:$0]  %s14_s8, 128, %s16_s11, [#allocation2] }
   0x3   :  { %53 = dma.done.wait [#allocation2], 128 }
   0x4   :  { %54 = vsyncadd [#allocation2], 4294967168 }
   0x5   :  { %22 = vsyncmov [#allocation2] }
   0x8   :  { %s23_s12 = vpop.sfrf %22 }
   0x9   :  { %p28_p0 = scmp.ne.s32.totalorder %s23_s12, 0 }
   0xb   :  { %27 = shalt.err (%p28_p0)  }

</bundles_post_ra>
